<compile_context>
chip_gen: v7x
topology: tpu7x:2x2x1
jax: 0.10.0
libtpu: 0.0.40
codegen_flags: <defaults>
</compile_context>

<pallas_src>
import jax
import jax.numpy as jnp
from jax.experimental import pallas as pl
from jax.experimental.pallas import tpu as pltpu


def _round_up(x, m):
    return ((x + m - 1) // m) * m


def _pick_hidden_tile(H, th_max):
    """Largest 128-aligned divisor of H that is <= th_max (or H if it fits)."""
    if H <= th_max:
        return H
    t = (min(th_max, H) // 128) * 128
    while t >= 128:
        if H % t == 0:
            return t
        t -= 128
    # TODO(synk): zero-pad H (W1 cols / b1 / W2 rows) when no 128-aligned
    # divisor exists instead of falling back to a full-H tile.
    return H


def _make_ffn_kernel(*, apply_dropout, acc_in_out):
    """Build the fused kernel.

    Ref order: x, W1, b1, W2, b2, [drop_scale,] out, [f32 acc scratch].
    """

    def kernel(*refs):
        if apply_dropout:
            x_ref, w1_ref, b1_ref, w2_ref, b2_ref, drop_ref, o_ref = refs[:7]
            rest = refs[7:]
        else:
            x_ref, w1_ref, b1_ref, w2_ref, b2_ref, o_ref = refs[:6]
            drop_ref = None
            rest = refs[6:]
        acc_ref = o_ref if acc_in_out else rest[0]

        # Grid queries hoisted to top level (NOT inside pl.when bodies).
        h_idx = pl.program_id(1)
        n_h = pl.num_programs(1)

        # Linear 1 + ReLU on this hidden tile: (tm, E) @ (E, th) -> (tm, th).
        x_tile = x_ref[...].astype(jnp.bfloat16)     # x is read once; cast here
        hid = jnp.dot(x_tile, w1_ref[...], preferred_element_type=jnp.float32)
        hid = jnp.maximum(hid + b1_ref[...], 0.0)

        # Partial Linear 2: (tm, th) @ (th, E) with f32 accumulation.
        partial = jnp.dot(hid.astype(w2_ref.dtype), w2_ref[...],
                          preferred_element_type=jnp.float32)

        @pl.when(h_idx == 0)
        def _init():
            acc_ref[...] = partial.astype(acc_ref.dtype)

        @pl.when(h_idx > 0)
        def _accumulate():
            acc_ref[...] += partial.astype(acc_ref.dtype)

        @pl.when(h_idx == n_h - 1)
        def _finalize():
            out = acc_ref[...].astype(jnp.float32) + b2_ref[...]
            if apply_dropout:
                # drop_ref holds 0 or 1/(1-p) per element (inverted dropout).
                out = out * drop_ref[...].astype(jnp.float32)
            o_ref[...] = out.astype(o_ref.dtype)

    return kernel


def feed_forward(x, params, *, dropout_rate, training=False, seed=0,
                 tm=None, th=None):
    """x: (..., E). Returns the same shape. tm/th=None -> auto from VMEM."""
    w1, b1, w2, b2 = params
    orig_shape = x.shape
    E = orig_shape[-1]
    H = w1.shape[1]                                  # 4 * E
    M = 1
    for d in orig_shape[:-1]:
        M *= d

    if training and dropout_rate >= 1.0:             # torch Dropout(p=1) -> 0
        return jnp.zeros(orig_shape, x.dtype)
    apply_dropout = bool(training) and dropout_rate > 0.0

    # --- hardware budget -------------------------------------------------
    try:
        vmem_cap = int(pltpu.get_tpu_info().vmem_capacity_bytes)
    except Exception:
        vmem_cap = 64 * 1024 * 1024                  # conservative (v7x-sized)
    vmem_limit = int(min(max(vmem_cap - 12 * 2**20, 32 * 2**20), 100 * 2**20))

    # --- tile selection ---------------------------------------------------
    if tm is None:
        # Weight re-streaming roofline: v6e/v5e (128 MiB VMEM) want tm~1024,
        # v7x (64 MiB VMEM, 2 TC) wants tm~512.
        tm = 1024 if vmem_cap >= 100 * 2**20 else 512
    if th is None:
        th = 1024

    tm_eff = max(16, min(_round_up(tm, 16), _round_up(M, 16)))
    # Give the "parallel" row axis >= 2 tiles for megacore when M is large.
    if M >= 1024 and _round_up(M, tm_eff) // tm_eff == 1 and tm_eff >= 1024:
        tm_eff = _round_up((M + 1) // 2, 16)

    th_eff = _pick_hidden_tile(H, th)

    elem = jnp.dtype(x.dtype).itemsize
    use_acc_scratch = jnp.dtype(x.dtype) != jnp.dtype(jnp.float32)

    def _vmem_estimate(tm_, th_):
        b = 2 * tm_ * E * elem                       # x tile (double-buffered)
        b += 2 * E * th_ * 2 + 2 * th_ * E * 2       # W1 + W2 (bf16, 2 bufs)
        b += 2 * th_ * 4 + 2 * E * 4                 # biases
        b += 2 * tm_ * E * elem                      # output tile
        if use_acc_scratch:
            b += tm_ * E * 4                         # f32 accumulator
        if apply_dropout:
            b += 2 * tm_ * E * 4                     # keep-scale tile
        b += tm_ * th_ * 4 + tm_ * th_ * 2           # f32 hidden + bf16 copy
        return b

    budget = int(vmem_limit * 0.9)
    while _vmem_estimate(tm_eff, th_eff) > budget:
        if th_eff % 256 == 0 and th_eff >= 256:      # halve hidden tile first
            th_eff //= 2
        elif tm_eff > 16:
            tm_eff = max(16, _round_up(tm_eff // 2, 16))
        else:
            break

    M_pad = _round_up(M, tm_eff)
    rows = M_pad // tm_eff
    n_h = H // th_eff if H % th_eff == 0 else 1
    if H % th_eff != 0:
        th_eff = H
        n_h = 1

    # --- operands ---------------------------------------------------------
    x2d = x.reshape(M, E)
    if M_pad != M:
        x2d = jnp.pad(x2d, ((0, M_pad - M), (0, 0)))

    # Weights re-streamed every row tile -> keep them bf16 (no-op if pre-cast
    # via prepare_params); x stays in its own dtype and is cast in-kernel.
    w1_c = w1 if w1.dtype == jnp.bfloat16 else w1.astype(jnp.bfloat16)
    w2_c = w2 if w2.dtype == jnp.bfloat16 else w2.astype(jnp.bfloat16)
    b1_c = b1.astype(jnp.float32).reshape(1, H)
    b2_c = b2.astype(jnp.float32).reshape(1, E)

    in_specs = [
        pl.BlockSpec((tm_eff, E), lambda i, h: (i, 0)),    # x rows
        pl.BlockSpec((E, th_eff), lambda i, h: (0, h)),    # W1 tile
        pl.BlockSpec((1, th_eff), lambda i, h: (0, h)),    # b1 tile
        pl.BlockSpec((th_eff, E), lambda i, h: (h, 0)),    # W2 tile
        pl.BlockSpec((1, E), lambda i, h: (0, 0)),         # b2
    ]
    args = [x2d, w1_c, b1_c, w2_c, b2_c]

    if apply_dropout:
        keep_prob = 1.0 - float(dropout_rate)
        keep = jax.random.bernoulli(jax.random.PRNGKey(seed), keep_prob,
                                    (M_pad, E))
        drop_scale = keep.astype(jnp.float32) * (1.0 / keep_prob)
        in_specs.append(pl.BlockSpec((tm_eff, E), lambda i, h: (i, 0)))
        args.append(drop_scale)

    scratch_shapes = []
    if use_acc_scratch:
        scratch_shapes.append(pltpu.VMEM((tm_eff, E), jnp.float32))

    kernel = _make_ffn_kernel(apply_dropout=apply_dropout,
                              acc_in_out=not use_acc_scratch)

    # Bytes: x once, weights re-streamed per row tile, biases, output, mask.
    weight_bytes = rows * (E * H * 2 + H * E * 2)
    bytes_accessed = (M_pad * E * elem + weight_bytes + H * 4 + E * 4
                      + M_pad * E * elem)
    if apply_dropout:
        bytes_accessed += M_pad * E * 4
    cost = pl.CostEstimate(flops=4 * M_pad * E * H, transcendentals=0,
                           bytes_accessed=int(bytes_accessed))

    out2d = pl.pallas_call(
        kernel,
        out_shape=jax.ShapeDtypeStruct((M_pad, E), x.dtype),
        grid_spec=pltpu.PrefetchScalarGridSpec(
            num_scalar_prefetch=0,
            grid=(rows, n_h),
            in_specs=in_specs,
            out_specs=pl.BlockSpec((tm_eff, E), lambda i, h: (i, 0)),
            scratch_shapes=scratch_shapes,
        ),
        compiler_params=pltpu.CompilerParams(
            dimension_semantics=("parallel", "arbitrary"),
            vmem_limit_bytes=vmem_limit),
        cost_estimate=cost,
    )(*args)

    return out2d[:M].reshape(orig_shape)


def init_params(key, embedding_dim):
    """Init mirroring torch.nn.Linear (U[-1/sqrt(fan_in), 1/sqrt(fan_in)])."""
    E, H = embedding_dim, embedding_dim * 4
    k1, k2, k3, k4 = jax.random.split(key, 4)
    lim1 = 1.0 / jnp.sqrt(E)
    lim2 = 1.0 / jnp.sqrt(H)
    w1 = jax.random.uniform(k1, (E, H), jnp.float32, -lim1, lim1)
    b1 = jax.random.uniform(k2, (1, H), jnp.float32, -lim1, lim1)
    w2 = jax.random.uniform(k3, (H, E), jnp.float32, -lim2, lim2)
    b2 = jax.random.uniform(k4, (1, E), jnp.float32, -lim2, lim2)
    return w1, b1, w2, b2


def prepare_params(params):
    """One-time bf16 cast of the (re-streamed) weights; biases stay f32."""
    w1, b1, w2, b2 = params
    return (w1.astype(jnp.bfloat16), b1.astype(jnp.float32),
            w2.astype(jnp.bfloat16), b2.astype(jnp.float32))


def feed_forward_ref(x, params):
    w1, b1, w2, b2 = params
    h = jnp.maximum(x @ w1.astype(jnp.float32) + b1[0], 0.0)
    return h @ w2.astype(jnp.float32) + b2[0]


if __name__ == "__main__":
    key = jax.random.PRNGKey(0)
    kx, kp = jax.random.split(key)

    B, T, E = 2, 8, 128          # lane-dense embedding (multiple of 128)
    dropout_rate = 0.1

    x = jax.random.normal(kx, (B, T, E), dtype=jnp.float32)
    params_f32 = init_params(kp, E)
    params = prepare_params(params_f32)   # weights cast to bf16 once, up front

    # Eval-mode forward (dropout is identity at inference, matching model.eval()).
    out = feed_forward(x, params, dropout_rate=dropout_rate, training=False)
    out = jax.block_until_ready(out)

    ref = feed_forward_ref(x, params_f32)
    assert out.shape == (B, T, E)
    # bf16 matmul operands (f32 accumulation) vs pure-f32 reference.
    assert jnp.allclose(out, ref, atol=5e-2, rtol=5e-2), "mismatch vs reference"

    # Exercise the training (dropout) path once.
    out_tr = feed_forward(x, params, dropout_rate=dropout_rate,
                          training=True, seed=123)
    out_tr = jax.block_until_ready(out_tr)
    assert out_tr.shape == (B, T, E)
    assert bool(jnp.all(jnp.isfinite(out_tr)))
    keep_frac = float(jnp.mean(out_tr != 0.0))
    assert 0.5 <= keep_frac <= 1.0, f"dropout kept fraction looks wrong: {keep_frac}"

    print("KERNEL_OK")
</pallas_src>

<mosaic_0001>
module attributes {stable_mosaic.version = 11 : i64} {
  func.func @kernel(%arg0: i32, %arg1: i32, %arg2: memref<16x128xf32, #tpu.memory_space<vmem>>, %arg3: memref<128x512xbf16, #tpu.memory_space<vmem>>, %arg4: memref<1x512xf32, #tpu.memory_space<vmem>>, %arg5: memref<512x128xbf16, #tpu.memory_space<vmem>>, %arg6: memref<1x128xf32, #tpu.memory_space<vmem>>, %arg7: memref<16x128xf32, #tpu.memory_space<vmem>>) attributes {dimension_semantics = [#tpu.dimension_semantics<parallel>, #tpu.dimension_semantics<arbitrary>], iteration_bounds = array<i64: 1, 1>, scalar_prefetch = 0 : i64, scratch_operands = 0 : i64, tpu.core_type = #tpu.core_type<tc>, window_params = [{transform_indices = @transform_0, window_bounds = array<i64: 16, 128>}, {transform_indices = @transform_1, window_bounds = array<i64: 128, 512>}, {transform_indices = @transform_2, window_bounds = array<i64: 1, 512>}, {transform_indices = @transform_3, window_bounds = array<i64: 512, 128>}, {pipeline_mode = #tpu.pipeline_mode<synchronous>, transform_indices = @transform_4, window_bounds = array<i64: 1, 128>}, {transform_indices = @transform_5, window_bounds = array<i64: 16, 128>}]} {
    %c0 = arith.constant 0 : index
    %c0_0 = arith.constant 0 : index
    %0 = vector.load %arg2[%c0, %c0_0] : memref<16x128xf32, #tpu.memory_space<vmem>>, vector<16x128xf32>
    %1 = arith.truncf %0 : vector<16x128xf32> to vector<16x128xbf16>
    %c0_1 = arith.constant 0 : index
    %c0_2 = arith.constant 0 : index
    %2 = vector.load %arg3[%c0_1, %c0_2] : memref<128x512xbf16, #tpu.memory_space<vmem>>, vector<128x512xbf16>
    %cst = arith.constant dense<0.000000e+00> : vector<16x512xf32>
    %3 = tpu.matmul %1, %2, %cst {dimension_numbers = #tpu.dot_dimension_numbers<[1], [0], [0], [1], [0, 0, 1, 1], [], []>} : vector<16x128xbf16>, vector<128x512xbf16>, vector<16x512xf32> -> vector<16x512xf32>
    %c0_3 = arith.constant 0 : index
    %c0_4 = arith.constant 0 : index
    %4 = vector.load %arg4[%c0_3, %c0_4] : memref<1x512xf32, #tpu.memory_space<vmem>>, vector<1x512xf32>
    %5 = vector.broadcast %4 : vector<1x512xf32> to vector<16x512xf32>
    %6 = arith.addf %3, %5 : vector<16x512xf32>
    %cst_5 = arith.constant 0.000000e+00 : f32
    %7 = vector.broadcast %cst_5 : f32 to vector<16x512xf32>
    %8 = arith.maximumf %6, %7 : vector<16x512xf32>
    %9 = arith.truncf %8 : vector<16x512xf32> to vector<16x512xbf16>
    %c0_6 = arith.constant 0 : index
    %c0_7 = arith.constant 0 : index
    %10 = vector.load %arg5[%c0_6, %c0_7] : memref<512x128xbf16, #tpu.memory_space<vmem>>, vector<512x128xbf16>
    %cst_8 = arith.constant dense<0.000000e+00> : vector<16x128xf32>
    %11 = tpu.matmul %9, %10, %cst_8 {dimension_numbers = #tpu.dot_dimension_numbers<[1], [0], [0], [1], [0, 0, 1, 1], [], []>} : vector<16x512xbf16>, vector<512x128xbf16>, vector<16x128xf32> -> vector<16x128xf32>
    %c0_i32 = arith.constant 0 : i32
    %12 = arith.cmpi eq, %arg1, %c0_i32 : i32
    %13 = arith.extui %12 : i1 to i32
    %c0_i32_9 = arith.constant 0 : i32
    %14 = arith.cmpi ne, %13, %c0_i32_9 : i32
    scf.if %14 {
      %c0_14 = arith.constant 0 : index
      %c0_15 = arith.constant 0 : index
      %21 = vector.load %arg7[%c0_14, %c0_15] : memref<16x128xf32, #tpu.memory_space<vmem>>, vector<16x128xf32>
      tpu.vector_store %arg7[%c0_14, %c0_15], %11 {strides = array<i32>} : memref<16x128xf32, #tpu.memory_space<vmem>>, vector<16x128xf32>,
    } else {
    }
    %c0_i32_10 = arith.constant 0 : i32
    %15 = arith.cmpi sgt, %arg1, %c0_i32_10 : i32
    %16 = arith.extui %15 : i1 to i32
    %c0_i32_11 = arith.constant 0 : i32
    %17 = arith.cmpi ne, %16, %c0_i32_11 : i32
    scf.if %17 {
      %c0_14 = arith.constant 0 : index
      %c0_15 = arith.constant 0 : index
      %21 = vector.load %arg7[%c0_14, %c0_15] : memref<16x128xf32, #tpu.memory_space<vmem>>, vector<16x128xf32>
      %22 = arith.addf %21, %11 : vector<16x128xf32>
      %c0_16 = arith.constant 0 : index
      %c0_17 = arith.constant 0 : index
      %23 = vector.load %arg7[%c0_16, %c0_17] : memref<16x128xf32, #tpu.memory_space<vmem>>, vector<16x128xf32>
      tpu.vector_store %arg7[%c0_16, %c0_17], %22 {strides = array<i32>} : memref<16x128xf32, #tpu.memory_space<vmem>>, vector<16x128xf32>,
    } else {
    }
    %c0_i32_12 = arith.constant 0 : i32
    %18 = arith.cmpi eq, %arg1, %c0_i32_12 : i32
    %19 = arith.extui %18 : i1 to i32
    %c0_i32_13 = arith.constant 0 : i32
    %20 = arith.cmpi ne, %19, %c0_i32_13 : i32
    scf.if %20 {
      %c0_14 = arith.constant 0 : index
      %c0_15 = arith.constant 0 : index
      %21 = vector.load %arg7[%c0_14, %c0_15] : memref<16x128xf32, #tpu.memory_space<vmem>>, vector<16x128xf32>
      %c0_16 = arith.constant 0 : index
      %c0_17 = arith.constant 0 : index
      %22 = vector.load %arg6[%c0_16, %c0_17] : memref<1x128xf32, #tpu.memory_space<vmem>>, vector<1x128xf32>
      %23 = vector.broadcast %22 : vector<1x128xf32> to vector<16x128xf32>
      %24 = arith.addf %21, %23 : vector<16x128xf32>
      %c0_18 = arith.constant 0 : index
      %c0_19 = arith.constant 0 : index
      %25 = vector.load %arg7[%c0_18, %c0_19] : memref<16x128xf32, #tpu.memory_space<vmem>>, vector<16x128xf32>
      tpu.vector_store %arg7[%c0_18, %c0_19], %24 {strides = array<i32>} : memref<16x128xf32, #tpu.memory_space<vmem>>, vector<16x128xf32>,
    } else {
    }
    return
  }
  func.func @transform_0(%arg0: i32, %arg1: i32) -> (i32, i32) {
    %c0_i32 = arith.constant 0 : i32
    %c0_i32_0 = arith.constant 0 : i32
    return %arg0, %c0_i32 : i32, i32
  }
  func.func @transform_1(%arg0: i32, %arg1: i32) -> (i32, i32) {
    %c0_i32 = arith.constant 0 : i32
    %c0_i32_0 = arith.constant 0 : i32
    return %c0_i32, %arg1 : i32, i32
  }
  func.func @transform_2(%arg0: i32, %arg1: i32) -> (i32, i32) {
    %c0_i32 = arith.constant 0 : i32
    %c0_i32_0 = arith.constant 0 : i32
    return %c0_i32, %arg1 : i32, i32
  }
  func.func @transform_3(%arg0: i32, %arg1: i32) -> (i32, i32) {
    %c0_i32 = arith.constant 0 : i32
    %c0_i32_0 = arith.constant 0 : i32
    return %arg1, %c0_i32 : i32, i32
  }
  func.func @transform_4(%arg0: i32, %arg1: i32) -> (i32, i32) {
    %c0_i32 = arith.constant 0 : i32
    %c0_i32_0 = arith.constant 0 : i32
    %c0_i32_1 = arith.constant 0 : i32
    return %c0_i32, %c0_i32_0 : i32, i32
  }
  func.func @transform_5(%arg0: i32, %arg1: i32) -> (i32, i32) {
    %c0_i32 = arith.constant 0 : i32
    %c0_i32_0 = arith.constant 0 : i32
    return %arg0, %c0_i32 : i32, i32
  }
}

</mosaic_0001>

<bundles_post_ra>
// kernel: tpu_custom_call.1
= control target key start
LH: loop header
LB: loop body
LE: loop exit
PB: predicated region body
PF: predicated region fallthrough
CT: control target
= control target key end

     0   :  { %10 = vsyncpa [#allocation3], 0  ;;  %s1161_s0 = inlined_call_operand.hbm [shape: f32[16,128], index: 0, kind: input, shape index: {}]   ;;  %s1162_s1 = inlined_call_operand.hbm [shape: bf16[128,512], index: 1, kind: input, shape index: {}]   ;;  %s1163_s2 = inlined_call_operand.vmem [shape: f32[1,512], index: 2, kind: input, shape index: {}]   ;;  %s1164_s3 = inlined_call_operand.hbm [shape: bf16[512,128], index: 3, kind: input, shape index: {}]   ;;  %s1165_s4 = inlined_call_operand.vmem [shape: f32[1,128], index: 4, kind: input, shape index: {}]   ;;  %s1166_s5 = inlined_call_operand.hbm [shape: f32[16,128], index: 5, kind: output, shape index: {}]  }
   0x1   :  { %11 = vsyncpa [#allocation6], 0 }
   0x2   :  { %12 = vsyncpa [#allocation4], 0  ;;  %s1060_s18 = smov [#allocation5]   ;;  %s966_s22 = scalar_lea.hbm %s1162_s1, 4096 }
   0x3   :  { %s30_s19 = sshll.u32 %s1060_s18, 4  ;;  %p967_p0 = scmp.ne.s32.totalorder %s1162_s1, %s966_s22  ;;  %s31_s19 = int_to_ptr.vmem [resolvable:$true] %s30_s19 }
   0x4   :  { %p970_p1 = scmp.lt.u32.totalorder %s966_s22, %s1162_s1 }
   0x6   :  { %p972_p2 = pnand %p970_p1, %p967_p0 }
   0x8   :  { %975 = shalt.err (!%p972_p2)
}
   0x9   :  { %s976_s27 = scalar_lea.vmem %s31_s19, 4096  ;;  %p981_p4 = scmp.lt.s32.totalorder %s31_s19, %s31_s19 }
   0xa   :  { %p977_p3 = scmp.ne.s32.totalorder %s31_s19, %s976_s27  ;;  %p982_p5 = scmp.lt.s32.totalorder %s976_s27, %s976_s27 }
   0xc   :  { %p983_p6 = por %p982_p5, %p981_p4 }
   0xe   :  { %p984_p7 = pnand %p983_p6, %p977_p3 }
  0x10   :  { %987 = shalt.err (!%p984_p7)
}
  0x11   :  { %s1061_s28 = smov 256   ;;  %s1062_s29 = smov 16  }
  0x12   :  { %36 = dma.hbm_to_vmem [thread:$0]  %s1162_s1, 4096, %s31_s19, [#allocation6], %s1061_s28, %s1061_s28, %s1062_s29  }
  0x13   :  { %s1063_s7 = smov [#allocation2]   ;;  %s988_s11 = scalar_lea.hbm %s1161_s0, 256 }
  0x14   :  { %s18_s8 = sshll.u32 %s1063_s7, 4  ;;  %p989_p8 = scmp.ne.s32.totalorder %s1161_s0, %s988_s11  ;;  %s19_s8 = int_to_ptr.vmem [resolvable:$true] %s18_s8 }
  0x15   :  { %p992_p9 = scmp.lt.u32.totalorder %s988_s11, %s1161_s0 }
  0x17   :  { %p994_p10 = pnand %p992_p9, %p989_p8 }
  0x19   :  { %997 = shalt.err (!%p994_p10)
}
  0x1a   :  { %s998_s16 = scalar_lea.vmem %s19_s8, 256  ;;  %p1003_p12 = scmp.lt.s32.totalorder %s19_s8, %s19_s8 }
  0x1b   :  { %p999_p11 = scmp.ne.s32.totalorder %s19_s8, %s998_s16  ;;  %p1004_p13 = scmp.lt.s32.totalorder %s998_s16, %s998_s16 }
  0x1d   :  { %p1005_p0 = por %p1004_p13, %p1003_p12 }
  0x1f   :  { %p1006_p1 = pnand %p1005_p0, %p999_p11 }
  0x21   :  { %1009 = shalt.err (!%p1006_p1)
}
  0x22   :  { %s1064_s1 = smov 128   ;;  %s1065_s17 = smov 8  }
  0x23   :  { %24 = dma.hbm_to_vmem [thread:$0]  %s1161_s0, 256, %s19_s8, [#allocation3], %s1064_s1, %s1064_s1, %s1065_s17  }
  0x24   :  { %s1066_s20 = smov [#allocation7]   ;;  %s1010_s24 = scalar_lea.hbm %s1164_s3, 4096 }
  0x25   :  { %s44_s21 = sshll.u32 %s1066_s20, 4  ;;  %p1011_p2 = scmp.ne.s32.totalorder %s1164_s3, %s1010_s24  ;;  %s45_s21 = int_to_ptr.vmem [resolvable:$true] %s44_s21 }
  0x26   :  { %p1014_p3 = scmp.lt.u32.totalorder %s1010_s24, %s1164_s3 }
  0x28   :  { %p1016_p4 = pnand %p1014_p3, %p1011_p2 }
  0x2a   :  { %1019 = shalt.err (!%p1016_p4)
}
  0x2b   :  { %s1020_s29 = scalar_lea.vmem %s45_s21, 4096  ;;  %p1025_p6 = scmp.lt.s32.totalorder %s45_s21, %s45_s21 }
  0x2c   :  { %p1021_p5 = scmp.ne.s32.totalorder %s45_s21, %s1020_s29  ;;  %p1026_p7 = scmp.lt.s32.totalorder %s1020_s29, %s1020_s29 }
  0x2e   :  { %p1027_p8 = por %p1026_p7, %p1025_p6 }
  0x30   :  { %p1028_p9 = pnand %p1027_p8, %p1021_p5 }
  0x32   :  { %1031 = shalt.err (!%p1028_p9)
}
  0x33   :  { %s1067_s0 = smov 64   ;;  %s1068_s30 = smov 4  }
  0x34   :  { %50 = dma.hbm_to_vmem [thread:$0]  %s1164_s3, 4096, %s45_s21, [#allocation6], %s1067_s0, %s1067_s0, %s1068_s30  }
  0x35   :  { %1054 = dma.done.wait [#allocation3], 256  }
  0x36   :  { %1055 = vsyncadd [#allocation3], 4294967040 }
  0x37   :  { %1056 = dma.done.wait [#allocation6], 8192  }
  0x38   :  { %1057 = vsyncadd [#allocation6], 4294959104  ;;  %v1069_v0 = vmov 0   ;;  %v886_v1 = vld [vmem:[#allocation5 + $0x4] ss:$16 sps:$4 sm:$0xff]   ;;  %v64_v34 = vld [vmem:[#allocation2 + $0x8] sm:$0xff] }
  0x39   :  { %312 = vmatprep.mubr.bf16.mxu0 %v1069_v0  ;;  %355 = vmatprep.mubr.bf16.mxu1 %v1069_v0  ;;  %v888_v2 = vld [vmem:[#allocation5 + $0xc] ss:$16 sps:$4 sm:$0xff]   ;;  %v890_v3 = vld [vmem:[#allocation5] ss:$16 sps:$4 sm:$0xff]   ;;  %v891_v4 = vld [vmem:[#allocation5 + $0x8] ss:$16 sps:$4 sm:$0xff]  }
  0x3a   :  { %280 = vmatprep.subr.bf16.mxu0 %v886_v1  ;;  %323 = vmatprep.subr.bf16.mxu1 %v888_v2  ;;  %v892_v5 = vld [vmem:[#allocation5 + $0x24] ss:$16 sps:$4 sm:$0xff]   ;;  %v894_v6 = vld [vmem:[#allocation5 + $0x2c] ss:$16 sps:$4 sm:$0xff]   ;;  %v896_v7 = vld [vmem:[#allocation5 + $0x20] ss:$16 sps:$4 sm:$0xff]  }
  0x3b   :  { %281 = vmatpush1.bf16.msra.mxu0 %v890_v3  ;;  %324 = vmatpush1.bf16.msra.mxu1 %v891_v4  ;;  %v897_v8 = vld [vmem:[#allocation5 + $0x28] ss:$16 sps:$4 sm:$0xff]   ;;  %v898_v9 = vld [vmem:[#allocation5 + $0x44] ss:$16 sps:$4 sm:$0xff]   ;;  %v900_v10 = vld [vmem:[#allocation5 + $0x4c] ss:$16 sps:$4 sm:$0xff]   ;;  %v100_v4 = vlaneseq }
  0x3c   :  { %282 = vmatprep.subr.bf16.mxu0 %v892_v5  ;;  %325 = vmatprep.subr.bf16.mxu1 %v894_v6  ;;  %v902_v11 = vld [vmem:[#allocation5 + $0x40] ss:$16 sps:$4 sm:$0xff]   ;;  %v903_v12 = vld [vmem:[#allocation5 + $0x48] ss:$16 sps:$4 sm:$0xff]   ;;  %v904_v13 = vld [vmem:[#allocation5 + $0x64] ss:$16 sps:$4 sm:$0xff]  }
  0x3d   :  { %v906_v14 = vld [vmem:[#allocation5 + $0x6c] ss:$16 sps:$4 sm:$0xff]   ;;  %v908_v15 = vld [vmem:[#allocation5 + $0x60] ss:$16 sps:$4 sm:$0xff]   ;;  %v909_v16 = vld [vmem:[#allocation5 + $0x68] ss:$16 sps:$4 sm:$0xff]  }
  0x3e   :  { %v910_v17 = vld [vmem:[#allocation5 + $0x84] ss:$16 sps:$4 sm:$0xff]   ;;  %v912_v18 = vld [vmem:[#allocation5 + $0x8c] ss:$16 sps:$4 sm:$0xff]   ;;  %v914_v19 = vld [vmem:[#allocation5 + $0x80] ss:$16 sps:$4 sm:$0xff]  }
  0x3f   :  { %283 = vmatpush1.bf16.msra.mxu0 %v896_v7  ;;  %326 = vmatpush1.bf16.msra.mxu1 %v897_v8  ;;  %v915_v20 = vld [vmem:[#allocation5 + $0x88] ss:$16 sps:$4 sm:$0xff]   ;;  %v916_v21 = vld [vmem:[#allocation5 + $0xa4] ss:$16 sps:$4 sm:$0xff]   ;;  %v918_v22 = vld [vmem:[#allocation5 + $0xac] ss:$16 sps:$4 sm:$0xff]  }
  0x40   :  { %284 = vmatprep.subr.bf16.mxu0 %v898_v9  ;;  %327 = vmatprep.subr.bf16.mxu1 %v900_v10  ;;  %v920_v23 = vld [vmem:[#allocation5 + $0xa0] ss:$16 sps:$4 sm:$0xff]   ;;  %v921_v24 = vld [vmem:[#allocation5 + $0xa8] ss:$16 sps:$4 sm:$0xff]   ;;  %v922_v25 = vld [vmem:[#allocation5 + $0xc4] ss:$16 sps:$4 sm:$0xff]  }
  0x41   :  { %v924_v26 = vld [vmem:[#allocation5 + $0xcc] ss:$16 sps:$4 sm:$0xff]   ;;  %v926_v27 = vld [vmem:[#allocation5 + $0xc0] ss:$16 sps:$4 sm:$0xff]   ;;  %v927_v28 = vld [vmem:[#allocation5 + $0xc8] ss:$16 sps:$4 sm:$0xff]  }
  0x42   :  { %v928_v29 = vld [vmem:[#allocation5 + $0xe4] ss:$16 sps:$4 sm:$0xff]   ;;  %v930_v30 = vld [vmem:[#allocation5 + $0xec] ss:$16 sps:$4 sm:$0xff]   ;;  %v932_v31 = vld [vmem:[#allocation5 + $0xe0] ss:$16 sps:$4 sm:$0xff]  }
  0x43   :  { %285 = vmatpush1.bf16.msra.mxu0 %v902_v11  ;;  %328 = vmatpush1.bf16.msra.mxu1 %v903_v12  ;;  %v933_v32 = vld [vmem:[#allocation5 + $0xe8] ss:$16 sps:$4 sm:$0xff]   ;;  %v63_v33 = vld [vmem:[#allocation2] sm:$0xff]  ;;  %v934_v35 = vld [vmem:[#allocation7 + $0x40] sm:$0xff]   ;;  %v101_v5 = vshrl.u32 %v100_v4, 7  ;;  %s1070_s10 = smov [#allocation8]  }
  0x44   :  { %286 = vmatprep.subr.bf16.mxu0 %v904_v13  ;;  %329 = vmatprep.subr.bf16.mxu1 %v906_v14  ;;  %v935_v36 = vld [vmem:[#allocation7 + $0xc0] sm:$0xff]   ;;  %v65_v38 = vpack.c.bf16 %v64_v34, %v63_v33  ;;  %v938_v40 = vld [vmem:[#allocation7 + $0x48] sm:$0xff]   ;;  %v942_v44 = vld [vmem:[#allocation7 + $0x50] sm:$0xff]   ;;  %s753_s11 = sshll.u32 %s1070_s10, 4  ;;  %s754_s11 = int_to_ptr.vmem [resolvable:$true] %s753_s11 }
  0x45   :  { %v936_v37 = vld [vmem:[#allocation7] sm:$0xff]   ;;  %v939_v41 = vld [vmem:[#allocation7 + $0xc8] sm:$0xff]   ;;  %v943_v45 = vld [vmem:[#allocation7 + $0xd0] sm:$0xff]   ;;  %v102_v6 = vsub.s32 0, %v101_v5  ;;  %v110_v7 = vsub.s32 2, %v101_v5  ;;  %v106_v9 = vsub.s32 1, %v101_v5  ;;  %p1037_p11 = scmp.lt.s32.totalorder %s754_s11, %s754_s11 }
  0x46   :  { %v937_v39 = vld [vmem:[#allocation7 + $0x80] sm:$0xff]   ;;  %v940_v42 = vld [vmem:[#allocation7 + $0x8] sm:$0xff]   ;;  %v944_v46 = vld [vmem:[#allocation7 + $0x10] sm:$0xff]   ;;  %v114_v10 = vsub.s32 3, %v101_v5  ;;  %s1032_s12 = scalar_lea.vmem %s754_s11, 256 }
  0x47   :  { %287 = vmatpush1.bf16.msra.mxu0 %v908_v15  ;;  %330 = vmatpush1.bf16.msra.mxu1 %v909_v16  ;;  %v941_v43 = vld [vmem:[#allocation7 + $0x88] sm:$0xff]   ;;  %v945_v47 = vld [vmem:[#allocation7 + $0x90] sm:$0xff]   ;;  %v946_v48 = vld [vmem:[#allocation7 + $0x58] sm:$0xff]   ;;  %p1033_p10 = scmp.ne.s32.totalorder %s754_s11, %s1032_s12  ;;  %p1038_p12 = scmp.lt.s32.totalorder %s1032_s12, %s1032_s12 }
  0x48   :  { %288 = vmatprep.subr.bf16.mxu0 %v910_v17  ;;  %331 = vmatprep.subr.bf16.mxu1 %v912_v18  ;;  %v947_v49 = vld [vmem:[#allocation7 + $0xd8] sm:$0xff]   ;;  %v950_v52 = vld [vmem:[#allocation7 + $0x60] sm:$0xff]   ;;  %v954_v56 = vld [vmem:[#allocation7 + $0x68] sm:$0xff]  }
  0x49   :  { %v948_v50 = vld [vmem:[#allocation7 + $0x18] sm:$0xff]   ;;  %v951_v53 = vld [vmem:[#allocation7 + $0xe0] sm:$0xff]   ;;  %v955_v57 = vld [vmem:[#allocation7 + $0xe8] sm:$0xff]   ;;  %p1039_p13 = por %p1038_p12, %p1037_p11 }
  0x4a   :  { %v949_v51 = vld [vmem:[#allocation7 + $0x98] sm:$0xff]   ;;  %v952_v54 = vld [vmem:[#allocation7 + $0x20] sm:$0xff]   ;;  %v956_v58 = vld [vmem:[#allocation7 + $0x28] sm:$0xff]  }
  0x4b   :  { %289 = vmatpush1.bf16.msra.mxu0 %v914_v19  ;;  %332 = vmatpush1.bf16.msra.mxu1 %v915_v20  ;;  %v953_v55 = vld [vmem:[#allocation7 + $0xa0] sm:$0xff]   ;;  %v957_v59 = vld [vmem:[#allocation7 + $0xa8] sm:$0xff]   ;;  %v958_v60 = vld [vmem:[#allocation7 + $0x70] sm:$0xff]   ;;  %p1040_p0 = pnand %p1039_p13, %p1033_p10 }
  0x4c   :  { %290 = vmatprep.subr.bf16.mxu0 %v916_v21  ;;  %333 = vmatprep.subr.bf16.mxu1 %v918_v22  ;;  %v959_v61 = vld [vmem:[#allocation7 + $0xf0] sm:$0xff]   ;;  %v962_v0 = vld [vmem:[#allocation7 + $0x78] sm:$0xff]  }
  0x4d   :  { %v960_v62 = vld [vmem:[#allocation7 + $0x30] sm:$0xff]   ;;  %v963_v1 = vld [vmem:[#allocation7 + $0xf8] sm:$0xff]  }
  0x4e   :  { %v961_v63 = vld [vmem:[#allocation7 + $0xb0] sm:$0xff]   ;;  %v964_v2 = vld [vmem:[#allocation7 + $0x38] sm:$0xff]  }
  0x4f   :  { %291 = vmatpush1.bf16.msra.mxu0 %v920_v23  ;;  %334 = vmatpush1.bf16.msra.mxu1 %v921_v24  ;;  %v965_v3 = vld [vmem:[#allocation7 + $0xb8] sm:$0xff]   ;;  %v98_v8 = vld [vmem:[%s1163_s2] sm:$0xf] }
  0x50   :  { %292 = vmatprep.subr.bf16.mxu0 %v922_v25  ;;  %335 = vmatprep.subr.bf16.mxu1 %v924_v26  ;;  %v103_v11 = vrot.slane %v98_v8, %v102_v6  ;;  %v111_v12 = vrot.slane %v98_v8, %v110_v7  ;;  %v107_v13 = vrot.slane %v98_v8, %v106_v9 }
  0x51   :  { %v115_v14 = vrot.slane %v98_v8, %v114_v10 }
  0x53   :  { %293 = vmatpush1.bf16.msra.mxu0 %v926_v27  ;;  %336 = vmatpush1.bf16.msra.mxu1 %v927_v28 }
  0x54   :  { %294 = vmatprep.subr.bf16.mxu0 %v928_v29  ;;  %337 = vmatprep.subr.bf16.mxu1 %v930_v30 }
  0x57   :  { %295 = vmatpush1.bf16.msra.mxu0 %v932_v31  ;;  %338 = vmatpush1.bf16.msra.mxu1 %v933_v32 }
  0x58   :  { %831 = vmatprep.subr.bf16.mxu0 %v934_v35  ;;  %853 = vmatprep.subr.bf16.mxu1 %v935_v36 }
  0x5a   :  { %313 = vmatmul.mubr.bf16.vlgmr.msra.gmra.mrb[0].mxu0 %v65_v38  ;;  %356 = vmatmul.mubr.bf16.vlgmr.msra.gmra.mrb[0].mxu1 %v65_v38 }
  0x5b   :  { %832 = vmatpush3.bf16.msra.mxu0 %v936_v37  ;;  %854 = vmatpush3.bf16.msra.mxu1 %v937_v39 }
  0x5c   :  { %833 = vmatprep.subr.bf16.mxu0 %v938_v40  ;;  %855 = vmatprep.subr.bf16.mxu1 %v939_v41 }
  0x5f   :  { %834 = vmatpush3.bf16.msra.mxu0 %v940_v42  ;;  %856 = vmatpush3.bf16.msra.mxu1 %v941_v43 }
  0x60   :  { %835 = vmatprep.subr.bf16.mxu0 %v942_v44  ;;  %857 = vmatprep.subr.bf16.mxu1 %v943_v45 }
  0x63   :  { %836 = vmatpush3.bf16.msra.mxu0 %v944_v46  ;;  %858 = vmatpush3.bf16.msra.mxu1 %v945_v47 }
  0x64   :  { %837 = vmatprep.subr.bf16.mxu0 %v946_v48  ;;  %859 = vmatprep.subr.bf16.mxu1 %v947_v49 }
  0x67   :  { %838 = vmatpush3.bf16.msra.mxu0 %v948_v50  ;;  %860 = vmatpush3.bf16.msra.mxu1 %v949_v51 }
  0x68   :  { %839 = vmatprep.subr.bf16.mxu0 %v950_v52  ;;  %861 = vmatprep.subr.bf16.mxu1 %v951_v53  ;;  %v830_v53 = vld [vmem:[%s1165_s4] ss:$0 sm:$0xff] }
  0x6b   :  { %840 = vmatpush3.bf16.msra.mxu0 %v952_v54  ;;  %862 = vmatpush3.bf16.msra.mxu1 %v953_v55 }
  0x6c   :  { %841 = vmatprep.subr.bf16.mxu0 %v954_v56  ;;  %863 = vmatprep.subr.bf16.mxu1 %v955_v57 }
  0x6f   :  { %842 = vmatpush3.bf16.msra.mxu0 %v956_v58  ;;  %864 = vmatpush3.bf16.msra.mxu1 %v957_v59 }
  0x70   :  { %843 = vmatprep.subr.bf16.mxu0 %v958_v60  ;;  %865 = vmatprep.subr.bf16.mxu1 %v959_v61 }
  0x73   :  { %844 = vmatpush3.bf16.msra.mxu0 %v960_v62  ;;  %866 = vmatpush3.bf16.msra.mxu1 %v961_v63 }
  0x74   :  { %845 = vmatprep.subr.bf16.mxu0 %v962_v0  ;;  %867 = vmatprep.subr.bf16.mxu1 %v963_v1 }
  0x77   :  { %846 = vmatpush3.bf16.msra.mxu0 %v964_v2  ;;  %868 = vmatpush3.bf16.msra.mxu1 %v965_v3 }
 0x12d   :  { %v314_v15 = vpop.f32.mrb[0].mxu0  ;;  %v357_v16 = vpop.f32.mrb[0].mxu1 }
 0x12e   :  { %v315_v17 = vadd.f32 %v314_v15, %v103_v11  ;;  %v358_v18 = vadd.f32 %v357_v16, %v111_v12  ;;  %v316_v19 = vpop.f32.mrb[1].mxu0  ;;  %v359_v20 = vpop.f32.mrb[1].mxu1 }
 0x12f   :  { %v317_v21 = vadd.f32 %v316_v19, %v107_v13  ;;  %v360_v22 = vadd.f32 %v359_v20, %v115_v14  ;;  %v318_v23 = vpop.f32.mrb[2].mxu0  ;;  %v361_v24 = vpop.f32.mrb[2].mxu1 }
 0x130   :  { %v319_v25 = vadd.f32 %v318_v23, %v103_v11  ;;  %v362_v26 = vadd.f32 %v361_v24, %v111_v12  ;;  %v320_v27 = vpop.f32.mrb[3].mxu0  ;;  %v363_v28 = vpop.f32.mrb[3].mxu1  ;;  %v366_v31 = vmax.f32 %v315_v17, 0.0  ;;  %v368_v32 = vmax.f32 %v358_v18, 0.0 }
 0x131   :  { %v321_v29 = vadd.f32 %v320_v27, %v107_v13  ;;  %v364_v30 = vadd.f32 %v363_v28, %v115_v14  ;;  %v367_v35 = vmax.f32 %v317_v21, 0.0  ;;  %v369_v36 = vmax.f32 %v360_v22, 0.0 }
 0x132   :  { %v370_v33 = vmax.f32 %v319_v25, 0.0  ;;  %v372_v34 = vmax.f32 %v362_v26, 0.0 }
 0x133   :  { %v371_v37 = vmax.f32 %v321_v29, 0.0  ;;  %v373_v38 = vmax.f32 %v364_v30, 0.0 }
 0x134   :  { %v374_v39 = vpack.c.bf16 %v370_v33, %v366_v31  ;;  %v376_v40 = vpack.c.bf16 %v372_v34, %v368_v32 }
 0x135   :  { %v375_v41 = vpack.c.bf16 %v371_v37, %v367_v35  ;;  %v377_v42 = vpack.c.bf16 %v373_v38, %v369_v36 }
 0x137   :  { %666 = vmatprep.mubr.bf16.mxu0 %v375_v41  ;;  %707 = vmatprep.mubr.bf16.mxu1 %v377_v42 }
 0x138   :  { %667 = vmatmul.mubr.bf16.vlgmr.msra.gmra.mrb[4].mxu0 %v374_v39  ;;  %708 = vmatmul.mubr.bf16.vlgmr.msra.gmra.mrb[4].mxu1 %v376_v40 }
 0x20b   :  { %v847_v43 = vpop.f32.mrb[4].mxu0  ;;  %v869_v44 = vpop.f32.mrb[4].mxu1 }
 0x20c   :  { %v848_v45 = vpop.f32.mrb[5].mxu0  ;;  %v870_v46 = vpop.f32.mrb[5].mxu1 }
 0x20d   :  { %v849_v47 = vadd.f32 %v848_v45, %v847_v43  ;;  %v871_v48 = vadd.f32 %v870_v46, %v869_v44  ;;  %v850_v49 = vpop.f32.mrb[6].mxu0  ;;  %v872_v50 = vpop.f32.mrb[6].mxu1 }
 0x20e   :  { %v851_v51 = vpop.f32.mrb[7].mxu0  ;;  %v873_v52 = vpop.f32.mrb[7].mxu1 }
 0x20f   :  { %v710_v54 = vadd.f32 %v871_v48, %v849_v47  ;;  %v852_v55 = vadd.f32 %v851_v51, %v850_v49  ;;  %v874_v56 = vadd.f32 %v873_v52, %v872_v50 }
 0x211   :  { %v713_v57 = vadd.f32 %v874_v56, %v852_v55  ;;  %v744_v58 = vadd.f32 %v830_v53, %v710_v54 }
 0x213   :  { %v745_v59 = vadd.f32 %v830_v53, %v713_v57  ;;  %746 = vst [vmem:[#allocation8] sm:$0xff] %v744_v58 }
 0x215   :  { %747 = vst [vmem:[#allocation8 + $0x8] sm:$0xff] %v745_v59 }
 0x216   :  { %1043 = shalt.err (!%p1040_p0)
}
 0x217   :  { %s1044_s14 = scalar_lea.hbm %s1166_s5, 256 }
 0x218   :  { %p1045_p1 = scmp.ne.s32.totalorder %s1166_s5, %s1044_s14  ;;  %p1048_p2 = scmp.lt.u32.totalorder %s1044_s14, %s1166_s5 }
 0x21a   :  { %p1050_p3 = pnand %p1048_p2, %p1045_p1 }
 0x21c   :  { %1053 = shalt.err (!%p1050_p3)
}
 0x21d   :  { %759 = dma.vmem_to_hbm [thread:$0]  %s754_s11, 256, %s1166_s5, [#allocation4], %s1064_s1, %s1064_s1, %s1065_s17  }
 0x21e   :  { %1058 = dma.done.wait [#allocation4], 256  }
 0x21f   :  { %1059 = vsyncadd [#allocation4], 4294967040 }
 0x220   :  { %763 = vsyncpa [#allocation3], 1 }
 0x221   :  { %764 = vsyncpa [#allocation6], 1 }
 0x222   :  { %765 = vsyncpa [#allocation4], 1 }

</bundles_post_ra>
